<compile_context>
chip_gen: v6e
topology: v6e:2x2x1
jax: 0.10.0
libtpu: 0.0.40
codegen_flags: <defaults>
</compile_context>

<pallas_src>
import functools

import jax
import jax.numpy as jnp
from jax.experimental import pallas as pl
from jax.experimental.pallas import tpu as pltpu

_LANE = 128
_SUBLANE = 8


def _round_up(x, m):
    return (x + m - 1) // m * m


def _iou_loss_kernel(pred_ref, gt_ref, piou_ref, out_ref,
                     inter_acc, union_acc, *, eps):
    # pred_ref / gt_ref : (tB, tR, 128) blocks (pred in its own dtype, gt narrow)
    # piou_ref / out_ref: (tB, 1) f32 blocks, resident across the r axis
    # inter_acc/union_acc: (tB, 128) f32 VMEM lane-wise accumulators
    r = pl.program_id(1)

    @pl.when(r == 0)
    def _init():
        inter_acc[...] = jnp.zeros_like(inter_acc)
        union_acc[...] = jnp.zeros_like(union_acc)

    pred = pred_ref[...]                         # (tB, tR, 128), native dtype
    gt = gt_ref[...].astype(jnp.float32)         # narrow -> f32 inside kernel
    pm = pred > 0                                # pred_mask = pred_logits > 0

    # intersection term: mask * gt ; union term: mask + gt - mask*gt
    inter_acc[...] += jnp.sum(jnp.where(pm, gt, 0.0), axis=1)        # (tB, 128)
    union_acc[...] += jnp.sum(jnp.where(pm, 1.0, gt), axis=1)        # (tB, 128)

    @pl.when(r == pl.num_programs(1) - 1)
    def _finalize():
        inter = jnp.sum(inter_acc[...], axis=1, keepdims=True)       # (tB, 1)
        union = jnp.sum(union_acc[...], axis=1, keepdims=True)       # (tB, 1)
        iou = inter / (union + eps)
        diff = iou - piou_ref[...]
        out_ref[...] = diff * diff


def iou_loss(pred_logits, pred_iou, gt_mask, *, eps=1e-07,
             max_rows_per_tile=512):
    """Pallas equivalent of IoULoss.forward (returns a scalar loss)."""
    assert pred_logits.shape == gt_mask.shape
    assert pred_logits.shape[1] == 1
    B = pred_logits.shape[0]
    N = 1
    for d in pred_logits.shape[2:]:
        N *= d

    pred = pred_logits.reshape(B, N)
    gt = gt_mask.reshape(B, N)            # keep narrow dtype: no host f32 upcast
    piou = pred_iou.reshape(B, 1).astype(jnp.float32)

    # Lane-dense layout: view H*W as (rows, 128).
    rows = pl.cdiv(N, _LANE)
    # Row tile: multiple of 8 sublanes, capped so an f32 input tile <= ~2 MiB.
    t_r = min(max(_round_up(max_rows_per_tile, _SUBLANE), _SUBLANE),
              _round_up(rows, _SUBLANE))
    rows_pad = _round_up(rows, t_r)
    n_pad = rows_pad * _LANE

    # Batch packing: amortize per-grid-step overhead for small masks.
    t_b = B if B <= 8 else 8
    b_pad = _round_up(B, t_b)

    if n_pad != N:
        # pad with 0: pred 0 -> (pred > 0) is False; gt 0 -> sums unchanged
        pred = jnp.pad(pred, ((0, 0), (0, n_pad - N)))
        gt = jnp.pad(gt, ((0, 0), (0, n_pad - N)))
    if b_pad != B:
        pred = jnp.pad(pred, ((0, b_pad - B), (0, 0)))
        gt = jnp.pad(gt, ((0, b_pad - B), (0, 0)))
        piou = jnp.pad(piou, ((0, b_pad - B), (0, 0)))

    pred = pred.reshape(b_pad, rows_pad, _LANE)
    gt = gt.reshape(b_pad, rows_pad, _LANE)

    grid = (b_pad // t_b, rows_pad // t_r)

    sq_err = pl.pallas_call(
        functools.partial(_iou_loss_kernel, eps=eps),
        out_shape=jax.ShapeDtypeStruct((b_pad, 1), jnp.float32),
        grid=grid,
        in_specs=[
            pl.BlockSpec((t_b, t_r, _LANE), lambda b, r: (b, r, 0)),
            pl.BlockSpec((t_b, t_r, _LANE), lambda b, r: (b, r, 0)),
            pl.BlockSpec((t_b, 1), lambda b, r: (b, 0)),
        ],
        out_specs=pl.BlockSpec((t_b, 1), lambda b, r: (b, 0)),
        scratch_shapes=[
            pltpu.VMEM((t_b, _LANE), jnp.float32),   # intersection accumulator
            pltpu.VMEM((t_b, _LANE), jnp.float32),   # union accumulator
        ],
        compiler_params=pltpu.CompilerParams(
            dimension_semantics=("parallel", "arbitrary"),
            vmem_limit_bytes=32 * 1024 * 1024,
        ),
    )(pred, gt, piou)

    # torch.mean((iou - pred_iou) ** 2) over the B real batch elements.
    return jnp.mean(sq_err[:B, 0])


def _iou_loss_ref(pred_logits, pred_iou, gt_mask, eps=1e-07):
    mask = (pred_logits > 0).astype(jnp.float32)
    gt = gt_mask.astype(jnp.float32)
    inter = jnp.sum(mask * gt, axis=(2, 3))
    union = jnp.sum(mask, axis=(2, 3)) + jnp.sum(gt, axis=(2, 3)) - inter
    iou = inter / (union + eps)
    return jnp.mean((iou - pred_iou.astype(jnp.float32)) ** 2)


if __name__ == "__main__":
    key = jax.random.PRNGKey(0)
    k1, k2, k3, k4, k5, k6 = jax.random.split(key, 6)

    # Test 1: shapes implied by the module (B, 1, H, W), gt kept narrow (bf16).
    B, C, H, W = 2, 1, 16, 16
    pred_logits = jax.random.normal(k1, (B, C, H, W), dtype=jnp.float32)
    gt_mask = (jax.random.uniform(k2, (B, C, H, W)) > 0.5).astype(jnp.bfloat16)
    pred_iou = jax.random.uniform(k3, (B, 1), dtype=jnp.float32)

    loss = iou_loss(pred_logits, pred_iou, gt_mask)
    jax.block_until_ready(loss)
    ref = _iou_loss_ref(pred_logits, pred_iou, gt_mask)
    assert jnp.allclose(loss, ref, atol=1e-6, rtol=1e-6), (loss, ref)

    # Test 2: exercise the multi-step H*W reduction (several row tiles),
    # lane padding (W not a multiple of 128) and batch padding.
    B2, H2, W2 = 3, 48, 52
    pred2 = jax.random.normal(k4, (B2, 1, H2, W2), dtype=jnp.float32)
    gt2 = (jax.random.uniform(k5, (B2, 1, H2, W2)) > 0.5).astype(jnp.bfloat16)
    piou2 = jax.random.uniform(k6, (B2, 1), dtype=jnp.float32)

    loss2 = iou_loss(pred2, piou2, gt2, max_rows_per_tile=8)
    jax.block_until_ready(loss2)
    ref2 = _iou_loss_ref(pred2, piou2, gt2)
    assert jnp.allclose(loss2, ref2, atol=1e-6, rtol=1e-6), (loss2, ref2)

    print("KERNEL_OK")
</pallas_src>

<mosaic_0001>
module attributes {stable_mosaic.version = 11 : i64} {
  func.func @_iou_loss_kernel(%arg0: i32, %arg1: i32, %arg2: memref<2x8x128xf32, #tpu.memory_space<vmem>>, %arg3: memref<2x8x128xbf16, #tpu.memory_space<vmem>>, %arg4: memref<2x1xf32, #tpu.memory_space<vmem>>, %arg5: memref<2x1xf32, #tpu.memory_space<vmem>>, %arg6: memref<2x128xf32, #tpu.memory_space<vmem>>, %arg7: memref<2x128xf32, #tpu.memory_space<vmem>>) attributes {dimension_semantics = [#tpu.dimension_semantics<parallel>, #tpu.dimension_semantics<arbitrary>], iteration_bounds = array<i64: 1, 1>, scalar_prefetch = 0 : i64, scratch_operands = 2 : i64, tpu.core_type = #tpu.core_type<tc>, window_params = [{transform_indices = @transform_0, window_bounds = array<i64: 2, 8, 128>}, {transform_indices = @transform_1, window_bounds = array<i64: 2, 8, 128>}, {transform_indices = @transform_2, window_bounds = array<i64: 2, 1>}, {transform_indices = @transform_3, window_bounds = array<i64: 2, 1>}]} {
    %c0_i32 = arith.constant 0 : i32
    %0 = arith.cmpi eq, %arg1, %c0_i32 : i32
    %1 = arith.extui %0 : i1 to i32
    %c0_i32_0 = arith.constant 0 : i32
    %2 = arith.cmpi ne, %1, %c0_i32_0 : i32
    scf.if %2 {
      %cst_20 = arith.constant 0.000000e+00 : f32
      %23 = vector.broadcast %cst_20 : f32 to vector<2x128xf32>
      %c0_21 = arith.constant 0 : index
      %c0_22 = arith.constant 0 : index
      %24 = vector.load %arg6[%c0_21, %c0_22] : memref<2x128xf32, #tpu.memory_space<vmem>>, vector<2x128xf32>
      tpu.vector_store %arg6[%c0_21, %c0_22], %23 {strides = array<i32>} : memref<2x128xf32, #tpu.memory_space<vmem>>, vector<2x128xf32>,
      %cst_23 = arith.constant 0.000000e+00 : f32
      %25 = vector.broadcast %cst_23 : f32 to vector<2x128xf32>
      %c0_24 = arith.constant 0 : index
      %c0_25 = arith.constant 0 : index
      %26 = vector.load %arg7[%c0_24, %c0_25] : memref<2x128xf32, #tpu.memory_space<vmem>>, vector<2x128xf32>
      tpu.vector_store %arg7[%c0_24, %c0_25], %25 {strides = array<i32>} : memref<2x128xf32, #tpu.memory_space<vmem>>, vector<2x128xf32>,
    } else {
    }
    %c0 = arith.constant 0 : index
    %c0_1 = arith.constant 0 : index
    %c0_2 = arith.constant 0 : index
    %3 = vector.load %arg2[%c0, %c0_1, %c0_2] : memref<2x8x128xf32, #tpu.memory_space<vmem>>, vector<2x8x128xf32>
    %c0_3 = arith.constant 0 : index
    %c0_4 = arith.constant 0 : index
    %c0_5 = arith.constant 0 : index
    %4 = vector.load %arg3[%c0_3, %c0_4, %c0_5] : memref<2x8x128xbf16, #tpu.memory_space<vmem>>, vector<2x8x128xbf16>
    %5 = arith.extf %4 : vector<2x8x128xbf16> to vector<2x8x128xf32>
    %cst = arith.constant 0.000000e+00 : f32
    %6 = vector.broadcast %cst : f32 to vector<2x8x128xf32>
    %7 = arith.cmpf ogt, %3, %6 : vector<2x8x128xf32>
    %c0_6 = arith.constant 0 : index
    %c0_7 = arith.constant 0 : index
    %8 = vector.load %arg6[%c0_6, %c0_7] : memref<2x128xf32, #tpu.memory_space<vmem>>, vector<2x128xf32>
    %cst_8 = arith.constant 0.000000e+00 : f32
    %9 = vector.broadcast %cst_8 : f32 to vector<2x8x128xf32>
    %10 = arith.select %7, %5, %9 : vector<2x8x128xi1>, vector<2x8x128xf32>
    %cst_9 = arith.constant dense<0.000000e+00> : vector<2x128xf32>
    %11 = vector.multi_reduction <add>, %10, %cst_9 [1] : vector<2x8x128xf32> to vector<2x128xf32>
    %12 = arith.addf %8, %11 : vector<2x128xf32>
    %c0_10 = arith.constant 0 : index
    %c0_11 = arith.constant 0 : index
    %13 = vector.load %arg6[%c0_10, %c0_11] : memref<2x128xf32, #tpu.memory_space<vmem>>, vector<2x128xf32>
    tpu.vector_store %arg6[%c0_10, %c0_11], %12 {strides = array<i32>} : memref<2x128xf32, #tpu.memory_space<vmem>>, vector<2x128xf32>,
    %c0_12 = arith.constant 0 : index
    %c0_13 = arith.constant 0 : index
    %14 = vector.load %arg7[%c0_12, %c0_13] : memref<2x128xf32, #tpu.memory_space<vmem>>, vector<2x128xf32>
    %cst_14 = arith.constant 1.000000e+00 : f32
    %15 = vector.broadcast %cst_14 : f32 to vector<2x8x128xf32>
    %16 = arith.select %7, %15, %5 : vector<2x8x128xi1>, vector<2x8x128xf32>
    %cst_15 = arith.constant dense<0.000000e+00> : vector<2x128xf32>
    %17 = vector.multi_reduction <add>, %16, %cst_15 [1] : vector<2x8x128xf32> to vector<2x128xf32>
    %18 = arith.addf %14, %17 : vector<2x128xf32>
    %c0_16 = arith.constant 0 : index
    %c0_17 = arith.constant 0 : index
    %19 = vector.load %arg7[%c0_16, %c0_17] : memref<2x128xf32, #tpu.memory_space<vmem>>, vector<2x128xf32>
    tpu.vector_store %arg7[%c0_16, %c0_17], %18 {strides = array<i32>} : memref<2x128xf32, #tpu.memory_space<vmem>>, vector<2x128xf32>,
    %c0_i32_18 = arith.constant 0 : i32
    %20 = arith.cmpi eq, %arg1, %c0_i32_18 : i32
    %21 = arith.extui %20 : i1 to i32
    %c0_i32_19 = arith.constant 0 : i32
    %22 = arith.cmpi ne, %21, %c0_i32_19 : i32
    scf.if %22 {
      %c0_20 = arith.constant 0 : index
      %c0_21 = arith.constant 0 : index
      %23 = vector.load %arg6[%c0_20, %c0_21] : memref<2x128xf32, #tpu.memory_space<vmem>>, vector<2x128xf32>
      %cst_22 = arith.constant dense<0.000000e+00> : vector<2xf32>
      %24 = vector.multi_reduction <add>, %23, %cst_22 [1] : vector<2x128xf32> to vector<2xf32>
      %25 = vector.shape_cast %24 : vector<2xf32> to vector<2x1xf32>
      %c0_23 = arith.constant 0 : index
      %c0_24 = arith.constant 0 : index
      %26 = vector.load %arg7[%c0_23, %c0_24] : memref<2x128xf32, #tpu.memory_space<vmem>>, vector<2x128xf32>
      %cst_25 = arith.constant dense<0.000000e+00> : vector<2xf32>
      %27 = vector.multi_reduction <add>, %26, %cst_25 [1] : vector<2x128xf32> to vector<2xf32>
      %28 = vector.shape_cast %27 : vector<2xf32> to vector<2x1xf32>
      %cst_26 = arith.constant 1.000000e-07 : f32
      %29 = vector.broadcast %cst_26 : f32 to vector<2x1xf32>
      %30 = arith.addf %28, %29 : vector<2x1xf32>
      %31 = arith.divf %25, %30 : vector<2x1xf32>
      %c0_27 = arith.constant 0 : index
      %c0_28 = arith.constant 0 : index
      %32 = vector.load %arg4[%c0_27, %c0_28] : memref<2x1xf32, #tpu.memory_space<vmem>>, vector<2x1xf32>
      %33 = arith.subf %31, %32 : vector<2x1xf32>
      %34 = arith.mulf %33, %33 : vector<2x1xf32>
      %c0_29 = arith.constant 0 : index
      %c0_30 = arith.constant 0 : index
      %35 = vector.load %arg5[%c0_29, %c0_30] : memref<2x1xf32, #tpu.memory_space<vmem>>, vector<2x1xf32>
      tpu.vector_store %arg5[%c0_29, %c0_30], %34 {strides = array<i32>} : memref<2x1xf32, #tpu.memory_space<vmem>>, vector<2x1xf32>,
    } else {
    }
    return
  }
  func.func @transform_0(%arg0: i32, %arg1: i32) -> (i32, i32, i32) {
    %c0_i32 = arith.constant 0 : i32
    %c0_i32_0 = arith.constant 0 : i32
    return %arg0, %arg1, %c0_i32 : i32, i32, i32
  }
  func.func @transform_1(%arg0: i32, %arg1: i32) -> (i32, i32, i32) {
    %c0_i32 = arith.constant 0 : i32
    %c0_i32_0 = arith.constant 0 : i32
    return %arg0, %arg1, %c0_i32 : i32, i32, i32
  }
  func.func @transform_2(%arg0: i32, %arg1: i32) -> (i32, i32) {
    %c0_i32 = arith.constant 0 : i32
    %c0_i32_0 = arith.constant 0 : i32
    return %arg0, %c0_i32 : i32, i32
  }
  func.func @transform_3(%arg0: i32, %arg1: i32) -> (i32, i32) {
    %c0_i32 = arith.constant 0 : i32
    %c0_i32_0 = arith.constant 0 : i32
    return %arg0, %c0_i32 : i32, i32
  }
}

</mosaic_0001>

<bundles_post_ra>
// kernel: tpu_custom_call.1
= control target key start
LH: loop header
LB: loop body
LE: loop exit
PB: predicated region body
PF: predicated region fallthrough
CT: control target
= control target key end

     0   :  { %8 = vsyncpa [#allocation5], 0  ;;  %s221_s0 = inlined_call_operand.hbm [shape: f32[2,8,128], index: 0, kind: input, shape index: {}]   ;;  %s222_s1 = inlined_call_operand.hbm [shape: bf16[2,8,128], index: 1, kind: input, shape index: {}]   ;;  %s223_s2 = inlined_call_operand.vmem [shape: f32[2,1], index: 2, kind: input, shape index: {}]   ;;  %s224_s3 = inlined_call_operand.vmem [shape: f32[2,1], index: 3, kind: output, shape index: {}]  }
   0x1   :  { %9 = vsyncpa [#allocation7], 0  ;;  %s182_s12 = smov [#allocation4]  }
   0x2   :  { %s15_s13 = sshll.u32 %s182_s12, 4  ;;  %s16_s13 = int_to_ptr.vmem [resolvable:$true] %s15_s13 }
   0x3   :  { %s146_s14 = scalar_lea.vmem %s16_s13, 256  ;;  %p151_p1 = scmp.lt.s32.totalorder %s16_s13, %s16_s13 }
   0x4   :  { %p147_p0 = scmp.ne.s32.totalorder %s16_s13, %s146_s14  ;;  %p152_p2 = scmp.lt.s32.totalorder %s146_s14, %s146_s14 }
   0x6   :  { %p153_p3 = por %p152_p2, %p151_p1 }
   0x8   :  { %p154_p4 = pnand %p153_p3, %p147_p0 }
   0xa   :  { %157 = shalt.err (!%p154_p4)
}
   0xb   :  { %s183_s15 = smov 128   ;;  %s184_s16 = smov 8  }
   0xc   :  { %21 = dma.hbm_to_vmem [thread:$0]  %s221_s0, 256, %s16_s13, [#allocation5], %s183_s15, %s183_s15, %s184_s16  }
   0xd   :  { %s185_s19 = smov [#allocation6]  }
   0xe   :  { %s27_s20 = sshll.u32 %s185_s19, 4  ;;  %s28_s20 = int_to_ptr.vmem [resolvable:$true] %s27_s20 }
   0xf   :  { %s166_s21 = scalar_lea.vmem %s28_s20, 128  ;;  %p171_p6 = scmp.lt.s32.totalorder %s28_s20, %s28_s20 }
  0x10   :  { %p167_p5 = scmp.ne.s32.totalorder %s28_s20, %s166_s21  ;;  %p172_p7 = scmp.lt.s32.totalorder %s166_s21, %s166_s21 }
  0x12   :  { %p173_p8 = por %p172_p7, %p171_p6 }
  0x14   :  { %p174_p9 = pnand %p173_p8, %p167_p5 }
  0x16   :  { %177 = shalt.err (!%p174_p9)
}
  0x17   :  { %s186_s22 = smov 64   ;;  %s187_s23 = smov 4  }
  0x18   :  { %33 = dma.hbm_to_vmem [thread:$0]  %s222_s1, 128, %s28_s20, [#allocation7], %s186_s22, %s186_s22, %s187_s23  }
  0x19   :  { %178 = dma.done.wait [#allocation5], 256  }
  0x1a   :  { %179 = vsyncadd [#allocation5], 4294967040 }
  0x1b   :  { %180 = dma.done.wait [#allocation7], 128  }
  0x1c   :  { %181 = vsyncadd [#allocation7], 4294967168  ;;  %v188_v0 = vmov 0.0   ;;  %v48_v1 = vld [vmem:[#allocation4] sm:$0xff]  ;;  %v49_v2 = vld [vmem:[#allocation4 + $0x8] sm:$0xff]  ;;  %vm73_vm2 = vcmask 1041409  }
  0x1d   :  { %47 = vst [vmem:[#allocation3] sm:$0x3] %v188_v0  ;;  %46 = vst [vmem:[#allocation2] sm:$0x3] %v188_v0  ;;  %v126_v3 = vld [vmem:[#allocation6] sm:$0xff]   ;;  %vm54_vm0 = vcmp.gt.f32.partialorder %v48_v1, 0.0 }
  0x1e   :  { %v127_v4 = vunpack.c.l.bf16 %v126_v3  ;;  %v128_v5 = vunpack.c.h.bf16 %v126_v3  ;;  %vm55_vm1 = vcmp.gt.f32.partialorder %v49_v2, 0.0  ;;  %vm103_vm3 = vcmask 1041408   ;;  %v114_v48 = vld [vmem:[%s223_s2] sm:$0x3] }
  0x1f   :  { %vm117_vm4 = vcmask 1024  }
  0x20   :  { %v79_v6 = vsel %vm54_vm0, 1.0, %v127_v4  ;;  %v80_v7 = vsel %vm55_vm1, 1.0, %v128_v5  ;;  %v57_v8 = vsel %vm54_vm0, %v127_v4, 0.0  ;;  %v58_v9 = vsel %vm55_vm1, %v128_v5, 0.0 }
  0x21   :  { %v81_v10 = vrot.slane %v79_v6, 4  ;;  %v87_v11 = vrot.slane %v80_v7, 4  ;;  %v59_v12 = vrot.slane %v57_v8, 4  ;;  %v65_v13 = vrot.slane %v58_v9, 4 }
  0x23   :  { %v82_v14 = vadd.f32 %v81_v10, %v79_v6  ;;  %v88_v15 = vadd.f32 %v87_v11, %v80_v7  ;;  %v60_v16 = vadd.f32 %v59_v12, %v57_v8  ;;  %v66_v17 = vadd.f32 %v65_v13, %v58_v9 }
  0x24   :  { %v78_v30 = vld [vmem:[#allocation3] sm:$0x3]  ;;  %v56_v33 = vld [vmem:[#allocation2] sm:$0x3] }
  0x25   :  { %v83_v18 = vrot.slane %v82_v14, 2  ;;  %v89_v19 = vrot.slane %v88_v15, 2  ;;  %v61_v20 = vrot.slane %v60_v16, 2  ;;  %v67_v21 = vrot.slane %v66_v17, 2 }
  0x27   :  { %v84_v22 = vadd.f32 %v83_v18, %v82_v14  ;;  %v90_v23 = vadd.f32 %v89_v19, %v88_v15  ;;  %v62_v24 = vadd.f32 %v61_v20, %v60_v16  ;;  %v68_v25 = vadd.f32 %v67_v21, %v66_v17 }
  0x29   :  { %v85_v26 = vrot.slane %v84_v22, 1  ;;  %v91_v27 = vrot.slane %v90_v23, 1  ;;  %v63_v28 = vrot.slane %v62_v24, 1  ;;  %v69_v29 = vrot.slane %v68_v25, 1 }
  0x2b   :  { %v86_v31 = vadd.f32 %v85_v26, %v84_v22  ;;  %v92_v32 = vadd.f32 %v91_v27, %v90_v23  ;;  %v64_v34 = vadd.f32 %v63_v28, %v62_v24  ;;  %v70_v35 = vadd.f32 %v69_v29, %v68_v25 }
  0x2d   :  { %v95_v36 = vsel %vm73_vm2, %v92_v32, %v86_v31  ;;  %v74_v37 = vsel %vm73_vm2, %v70_v35, %v64_v34 }
  0x2e   :  { %v97_v38 = vadd.f32 %v95_v36, %v78_v30  ;;  %v76_v39 = vadd.f32 %v74_v37, %v56_v33 }
  0x30   :  { %98 = vst [vmem:[#allocation3] sm:$0x3] %v97_v38  ;;  %77 = vst [vmem:[#allocation2] sm:$0x3] %v76_v39 }
  0x37   :  { %v107_v40 = vld [vmem:[#allocation3] sm:$0x3]  ;;  %v102_v41 = vld [vmem:[#allocation2] sm:$0x3] }
  0x38   :  { %v108_v42 = vsel %vm103_vm3, %v107_v40, 0.0  ;;  %v104_v43 = vsel %vm103_vm3, %v102_v41, 0.0 }
  0x39   :  { %109 = vadd.xlane.f32.xlu0 %v108_v42 }
  0x3d   :  { %105 = vadd.xlane.f32.xlu0 %v104_v43 }
  0xc2   :  { %v110_v44 = vpop.xlane.xlu0 %109 }
  0xc3   :  { %v111_v45 = vadd.f32 1e-07, %v110_v44 }
  0xc5   :  { %136 = vrcp.f32 %v111_v45 }
  0xc6   :  { %v106_v46 = vpop.xlane.xlu0 %105 }
  0xd2   :  { %v137_v47 = vpop.eup %136 }
  0xd3   :  { %v113_v49 = vmul.f32 %v137_v47, %v106_v46 }
  0xd5   :  { %v115_v50 = vsub.f32 %v113_v49, %v114_v48 }
  0xd7   :  { %v116_v51 = vmul.f32 %v115_v50, %v115_v50 }
  0xd9   :  { %118 = vst.msk [vmem:[%s224_s3] sm:$0x3] %vm117_vm4, %v116_v51 }
  0xda   :  { %123 = vsyncpa [#allocation5], 1 }
  0xdb   :  { %124 = vsyncpa [#allocation7], 1 }

</bundles_post_ra>
